<compile_context>
chip_gen: v6e
topology: v6e:2x2x1
jax: 0.10.0
libtpu: 0.0.40
codegen_flags: <defaults>
</compile_context>

<pallas_src>
import functools

import jax
import jax.numpy as jnp
import numpy as np
from jax.experimental import pallas as pl
from jax.experimental.pallas import tpu as pltpu


# ----------------------- small math helpers (used in-kernel) -----------------

def _dot(a, b):
    # MXU matmul, f32 accumulation, default precision.
    return jnp.dot(a, b, preferred_element_type=jnp.float32)


def _dot_t(a, b):
    # a @ b.T without materializing the transpose (MXU consumes RHS transposed).
    return jax.lax.dot_general(a, b, (((1,), (1,)), ((), ())),
                               preferred_element_type=jnp.float32)


def _gelu_tanh(x):
    # tanh-based GELU: one EUP tanh instead of an erf polynomial.
    c = 0.7978845608028654  # sqrt(2/pi)
    return 0.5 * x * (1.0 + jnp.tanh(c * (x + 0.044715 * x * x * x)))


def _layer_norm(x, g, b, eps):
    mean = jnp.mean(x, axis=-1, keepdims=True)
    var = jnp.mean((x - mean) ** 2, axis=-1, keepdims=True)
    return (x - mean) * jax.lax.rsqrt(var + eps) * g + b


# ------------------------------- Pallas kernel --------------------------------

def decoder_layer_kernel(x_ref, mask_ref,
                         wq_ref, bq_ref, wk_ref, bk_ref, wv_ref, bv_ref,
                         wo_ref, bo_ref,
                         ln1g_ref, ln1b_ref,
                         w1_ref, b1_ref, w2_ref, b2_ref,
                         ln2g_ref, ln2b_ref,
                         out_ref, prob_ref,
                         acc_ref, kcache_ref, vcache_ref,
                         *, q_tile, eps, scale, cache_kv):
    qi = pl.program_id(1)
    h = pl.program_id(2)
    nh = pl.num_programs(2)

    row0 = pl.multiple_of(qi * q_tile, q_tile)
    xq = x_ref[0, pl.ds(row0, q_tile), :]      # (TQ, H) query rows of this tile
    x_all = x_ref[0]                           # (S, H)  full sequence (K/V rows)
    mask = mask_ref[0]                         # (TQ, S) int32, 1 = masked

    # init attention-output accumulator with the output-projection bias
    # (added exactly once across the head loop)
    @pl.when(h == 0)
    def _():
        acc_ref[...] = jnp.broadcast_to(bo_ref[...], acc_ref.shape)

    # per-head Q projection; the head slice of each weight is chosen by the
    # BlockSpec index_map (DMA), so there is no in-kernel lane slicing.
    qh = (_dot(xq, wq_ref[0]) + bq_ref[0]) * scale      # (TQ, HD), scale folded in

    if cache_kv:
        # K/V projections depend only on (batch, head): compute them on the
        # first query tile and reuse across the remaining tiles.
        @pl.when(qi == 0)
        def _():
            kcache_ref[h] = _dot(x_all, wk_ref[0]) + bk_ref[0]   # (S, HD)
            vcache_ref[h] = _dot(x_all, wv_ref[0]) + bv_ref[0]   # (S, HD)
        kh = kcache_ref[h]
        vh = vcache_ref[h]
    else:
        kh = _dot(x_all, wk_ref[0]) + bk_ref[0]                  # (S, HD)
        vh = _dot(x_all, wv_ref[0]) + bv_ref[0]                  # (S, HD)

    s = _dot_t(qh, kh)                                  # (TQ, S)
    s = jnp.where(mask != 0, -1000000000.0, s)          # masked_fill_ semantics
    s = s - jnp.max(s, axis=-1, keepdims=True)
    e = jnp.exp(s)
    p = e * pl.reciprocal(jnp.sum(e, axis=-1, keepdims=True), approx=True)
    prob_ref[0, 0] = p                                  # one full-tile store/step

    # per-head contribution to the output projection, accumulated in f32 scratch
    acc_ref[...] += _dot(_dot(p, vh), wo_ref[0])        # (TQ, H)

    # finalize on the last head: residual+LN1, FFN (1x1 convs == matmuls), residual+LN2
    @pl.when(h == nh - 1)
    def _():
        y1 = _layer_norm(xq + acc_ref[...], ln1g_ref[...], ln1b_ref[...], eps)
        ff = _gelu_tanh(_dot(y1, w1_ref[...]) + b1_ref[...])
        ff_out = _dot(ff, w2_ref[...]) + b2_ref[...]
        out_ref[0] = _layer_norm(y1 + ff_out, ln2g_ref[...], ln2b_ref[...], eps)


# ------------------------------- wrapper ---------------------------------------

def decoder_layer(x, mask, params, *, num_head, head_dim, eps, q_tile=None,
                  kv_cache_budget_bytes=8 * 1024 * 1024):
    B, S, H = x.shape
    FF = params["w1"].shape[1]

    if q_tile is None:
        q_tile = S                                  # full extent always legal
        for cand in (256, 128, 64, 32, 16, 8):
            if cand <= S and S % cand == 0:
                q_tile = cand
                break
    assert S % q_tile == 0, "sequence length must be divisible by the query tile"
    n_qt = S // q_tile

    # Decide whether the per-head K/V cache fits VMEM (use the lane/sublane
    # padded footprint: last dim pads to 128 lanes, second-to-last to 8 sublanes).
    pad_hd = ((head_dim + 127) // 128) * 128
    pad_s = ((S + 7) // 8) * 8
    cache_kv = (2 * num_head * pad_s * pad_hd * 4) <= kv_cache_budget_bytes
    kv_shape = (num_head, S, head_dim) if cache_kv else (1, 8, 128)

    # With the K/V cache, tiles qi>0 depend on state written at qi==0, so the
    # query-tile axis must not be split across cores.
    if cache_kv and n_qt > 1:
        dim_sem = ("parallel", "arbitrary", "arbitrary")
    else:
        dim_sem = ("parallel", "parallel", "arbitrary")

    # Split weights per head in the wrapper (free layout plumbing): the kernel
    # then only ever does dense 2-D matmuls on DMA-selected head slices.
    wq_h = params["wq"].reshape(H, num_head, head_dim).transpose(1, 0, 2)  # (NH,H,HD)
    wk_h = params["wk"].reshape(H, num_head, head_dim).transpose(1, 0, 2)
    wv_h = params["wv"].reshape(H, num_head, head_dim).transpose(1, 0, 2)
    bq_h = params["bq"].reshape(1, num_head, head_dim).transpose(1, 0, 2)  # (NH,1,HD)
    bk_h = params["bk"].reshape(1, num_head, head_dim).transpose(1, 0, 2)
    bv_h = params["bv"].reshape(1, num_head, head_dim).transpose(1, 0, 2)
    wo_h = params["wo"].reshape(num_head, head_dim, H)                     # (NH,HD,H)

    kernel = functools.partial(decoder_layer_kernel, q_tile=q_tile, eps=eps,
                               scale=1.0 / float(head_dim) ** 0.5,
                               cache_kv=cache_kv)

    def const(shape):
        n = len(shape)
        return pl.BlockSpec(shape, lambda b, q, h, _n=n: (0,) * _n)

    def per_head(shape):
        n = len(shape)
        return pl.BlockSpec((1,) + tuple(shape[1:]),
                            lambda b, q, h, _n=n: (h,) + (0,) * (_n - 1))

    in_specs = [
        pl.BlockSpec((1, S, H), lambda b, q, h: (b, 0, 0)),        # x (full seq)
        pl.BlockSpec((1, q_tile, S), lambda b, q, h: (b, q, 0)),   # mask (query tile)
        per_head(wq_h.shape), per_head(bq_h.shape),
        per_head(wk_h.shape), per_head(bk_h.shape),
        per_head(wv_h.shape), per_head(bv_h.shape),
        per_head(wo_h.shape),
        const((1, H)),                    # bo
        const((1, H)), const((1, H)),     # LN1 gamma, beta
        const((H, FF)), const((1, FF)),   # conv1 (1x1)
        const((FF, H)), const((1, H)),    # conv2 (1x1)
        const((1, H)), const((1, H)),     # LN2 gamma, beta
    ]
    out_specs = [
        pl.BlockSpec((1, q_tile, H), lambda b, q, h: (b, q, 0)),
        pl.BlockSpec((1, 1, q_tile, S), lambda b, q, h: (b, h, q, 0)),
    ]
    out_shape = [
        jax.ShapeDtypeStruct((B, S, H), jnp.float32),
        jax.ShapeDtypeStruct((B, num_head, S, S), jnp.float32),
    ]

    return pl.pallas_call(
        kernel,
        grid=(B, n_qt, num_head),
        in_specs=in_specs,
        out_specs=out_specs,
        out_shape=out_shape,
        scratch_shapes=[pltpu.VMEM((q_tile, H), jnp.float32),     # attn-out acc
                        pltpu.VMEM(kv_shape, jnp.float32),        # K cache
                        pltpu.VMEM(kv_shape, jnp.float32)],       # V cache
        compiler_params=pltpu.CompilerParams(
            dimension_semantics=dim_sem,
            vmem_limit_bytes=32 * 1024 * 1024),
    )(x, mask,
      wq_h, bq_h, wk_h, bk_h, wv_h, bv_h, wo_h,
      params["bo"], params["ln1_g"], params["ln1_b"],
      params["w1"], params["b1"], params["w2"], params["b2"],
      params["ln2_g"], params["ln2_b"])


# ------------------------- pure-JAX reference (for checking) -------------------

def decoder_layer_ref(x, mask, params, *, num_head, head_dim, eps):
    B, S, H = x.shape

    def ln(z, g, b):
        m = jnp.mean(z, axis=-1, keepdims=True)
        v = jnp.mean((z - m) ** 2, axis=-1, keepdims=True)
        return (z - m) / jnp.sqrt(v + eps) * g + b

    q = x @ params["wq"] + params["bq"]
    k = x @ params["wk"] + params["bk"]
    v = x @ params["wv"] + params["bv"]
    q = q.reshape(B, S, num_head, head_dim).transpose(0, 2, 1, 3)
    k = k.reshape(B, S, num_head, head_dim).transpose(0, 2, 1, 3)
    v = v.reshape(B, S, num_head, head_dim).transpose(0, 2, 1, 3)
    scores = jnp.einsum("bhqd,bhkd->bhqk", q, k) / (head_dim ** 0.5)
    scores = jnp.where(mask[:, None] != 0, -1000000000.0, scores)
    prob = jax.nn.softmax(scores, axis=-1)
    ctx = jnp.einsum("bhqk,bhkd->bhqd", prob, v)
    ctx = ctx.transpose(0, 2, 1, 3).reshape(B, S, num_head * head_dim)
    attn = ctx @ params["wo"] + params["bo"]
    y1 = ln(x + attn, params["ln1_g"], params["ln1_b"])
    ff = jax.nn.gelu(y1 @ params["w1"] + params["b1"], approximate=False)
    ff_out = ff @ params["w2"] + params["b2"]
    y2 = ln(y1 + ff_out, params["ln2_g"], params["ln2_b"])
    return y2, prob


# ----------------------------------- main ---------------------------------------

if __name__ == "__main__":
    # small config consistent with the module
    B, S = 2, 8
    H = 32                 # hidden_dim == d_hidn
    NUM_HEAD = 4           # num_head == n_head
    HEAD_DIM = 8           # head_dim == d_head
    FF = 64                # ff_dim
    EPS = 1e-5             # layer_norm_epsilon
    # dropout: eval-mode identity (no-op)

    key = jax.random.PRNGKey(0)
    ks = jax.random.split(key, 16)
    D = NUM_HEAD * HEAD_DIM
    init = lambda k, shape: (0.02 * jax.random.normal(k, shape)).astype(jnp.float32)

    params = {
        "wq": init(ks[0], (H, D)),  "bq": init(ks[1], (1, D)),
        "wk": init(ks[2], (H, D)),  "bk": init(ks[3], (1, D)),
        "wv": init(ks[4], (H, D)),  "bv": init(ks[5], (1, D)),
        "wo": init(ks[6], (D, H)),  "bo": init(ks[7], (1, H)),
        "ln1_g": jnp.ones((1, H), jnp.float32), "ln1_b": jnp.zeros((1, H), jnp.float32),
        "w1": init(ks[8], (H, FF)), "b1": init(ks[9], (1, FF)),
        "w2": init(ks[10], (FF, H)), "b2": init(ks[11], (1, H)),
        "ln2_g": jnp.ones((1, H), jnp.float32), "ln2_b": jnp.zeros((1, H), jnp.float32),
    }

    x = jax.random.normal(ks[12], (B, S, H), dtype=jnp.float32)
    # causal self-attention mask: 1 above the diagonal (masked)
    mask = jnp.broadcast_to(
        jnp.triu(jnp.ones((S, S), jnp.int32), k=1), (B, S, S)).astype(jnp.int32)

    out, prob = decoder_layer(x, mask, params,
                              num_head=NUM_HEAD, head_dim=HEAD_DIM, eps=EPS)
    out = jax.block_until_ready(out)
    prob = jax.block_until_ready(prob)

    ref_out, ref_prob = decoder_layer_ref(x, mask, params,
                                          num_head=NUM_HEAD, head_dim=HEAD_DIM, eps=EPS)
    np.testing.assert_allclose(np.asarray(out), np.asarray(ref_out),
                               rtol=2e-3, atol=2e-3)
    np.testing.assert_allclose(np.asarray(prob), np.asarray(ref_prob),
                               rtol=2e-3, atol=2e-3)

    print("KERNEL_OK")
</pallas_src>

<mosaic_0001>
module attributes {stable_mosaic.version = 11 : i64} {
  func.func @decoder_layer_kernel(%arg0: i32, %arg1: i32, %arg2: i32, %arg3: memref<1x8x32xf32, #tpu.memory_space<vmem>>, %arg4: memref<1x8x8xi32, #tpu.memory_space<vmem>>, %arg5: memref<1x32x8xf32, #tpu.memory_space<vmem>>, %arg6: memref<1x1x8xf32, #tpu.memory_space<vmem>>, %arg7: memref<1x32x8xf32, #tpu.memory_space<vmem>>, %arg8: memref<1x1x8xf32, #tpu.memory_space<vmem>>, %arg9: memref<1x32x8xf32, #tpu.memory_space<vmem>>, %arg10: memref<1x1x8xf32, #tpu.memory_space<vmem>>, %arg11: memref<1x8x32xf32, #tpu.memory_space<vmem>>, %arg12: memref<1x32xf32, #tpu.memory_space<vmem>>, %arg13: memref<1x32xf32, #tpu.memory_space<vmem>>, %arg14: memref<1x32xf32, #tpu.memory_space<vmem>>, %arg15: memref<32x64xf32, #tpu.memory_space<vmem>>, %arg16: memref<1x64xf32, #tpu.memory_space<vmem>>, %arg17: memref<64x32xf32, #tpu.memory_space<vmem>>, %arg18: memref<1x32xf32, #tpu.memory_space<vmem>>, %arg19: memref<1x32xf32, #tpu.memory_space<vmem>>, %arg20: memref<1x32xf32, #tpu.memory_space<vmem>>, %arg21: memref<1x8x32xf32, #tpu.memory_space<vmem>>, %arg22: memref<1x1x8x8xf32, #tpu.memory_space<vmem>>, %arg23: memref<8x32xf32, #tpu.memory_space<vmem>>, %arg24: memref<4x8x8xf32, #tpu.memory_space<vmem>>, %arg25: memref<4x8x8xf32, #tpu.memory_space<vmem>>) attributes {dimension_semantics = [#tpu.dimension_semantics<parallel>, #tpu.dimension_semantics<parallel>, #tpu.dimension_semantics<arbitrary>], iteration_bounds = array<i64: 2, 1, 4>, scalar_prefetch = 0 : i64, scratch_operands = 3 : i64, tpu.core_type = #tpu.core_type<tc>, window_params = [{transform_indices = @transform_0, window_bounds = array<i64: 1, 8, 32>}, {transform_indices = @transform_1, window_bounds = array<i64: 1, 8, 8>}, {transform_indices = @transform_2, window_bounds = array<i64: 1, 32, 8>}, {transform_indices = @transform_3, window_bounds = array<i64: 1, 1, 8>}, {transform_indices = @transform_4, window_bounds = array<i64: 1, 32, 8>}, {transform_indices = @transform_5, window_bounds = array<i64: 1, 1, 8>}, {transform_indices = @transform_6, window_bounds = array<i64: 1, 32, 8>}, {transform_indices = @transform_7, window_bounds = array<i64: 1, 1, 8>}, {transform_indices = @transform_8, window_bounds = array<i64: 1, 8, 32>}, {pipeline_mode = #tpu.pipeline_mode<synchronous>, transform_indices = @transform_9, window_bounds = array<i64: 1, 32>}, {pipeline_mode = #tpu.pipeline_mode<synchronous>, transform_indices = @transform_10, window_bounds = array<i64: 1, 32>}, {pipeline_mode = #tpu.pipeline_mode<synchronous>, transform_indices = @transform_11, window_bounds = array<i64: 1, 32>}, {pipeline_mode = #tpu.pipeline_mode<synchronous>, transform_indices = @transform_12, window_bounds = array<i64: 32, 64>}, {pipeline_mode = #tpu.pipeline_mode<synchronous>, transform_indices = @transform_13, window_bounds = array<i64: 1, 64>}, {pipeline_mode = #tpu.pipeline_mode<synchronous>, transform_indices = @transform_14, window_bounds = array<i64: 64, 32>}, {pipeline_mode = #tpu.pipeline_mode<synchronous>, transform_indices = @transform_15, window_bounds = array<i64: 1, 32>}, {pipeline_mode = #tpu.pipeline_mode<synchronous>, transform_indices = @transform_16, window_bounds = array<i64: 1, 32>}, {pipeline_mode = #tpu.pipeline_mode<synchronous>, transform_indices = @transform_17, window_bounds = array<i64: 1, 32>}, {transform_indices = @transform_18, window_bounds = array<i64: 1, 8, 32>}, {transform_indices = @transform_19, window_bounds = array<i64: 1, 1, 8, 8>}]} {
    %c8_i32 = arith.constant 8 : i32
    %0 = arith.muli %arg1, %c8_i32 : i32
    %1 = tpu.assume_multiple %0, 8 : i32
    %c0 = arith.constant 0 : index
    %2 = arith.index_cast %1 : i32 to index
    %c0_0 = arith.constant 0 : index
    %3 = vector.load %arg3[%c0, %2, %c0_0] : memref<1x8x32xf32, #tpu.memory_space<vmem>>, vector<1x8x32xf32>
    %4 = vector.shape_cast %3 : vector<1x8x32xf32> to vector<8x32xf32>
    %c0_1 = arith.constant 0 : index
    %c0_2 = arith.constant 0 : index
    %c0_3 = arith.constant 0 : index
    %5 = vector.load %arg3[%c0_1, %c0_2, %c0_3] : memref<1x8x32xf32, #tpu.memory_space<vmem>>, vector<1x8x32xf32>
    %6 = vector.shape_cast %5 : vector<1x8x32xf32> to vector<8x32xf32>
    %c0_4 = arith.constant 0 : index
    %c0_5 = arith.constant 0 : index
    %c0_6 = arith.constant 0 : index
    %7 = vector.load %arg4[%c0_4, %c0_5, %c0_6] : memref<1x8x8xi32, #tpu.memory_space<vmem>>, vector<1x8x8xi32>
    %8 = vector.shape_cast %7 : vector<1x8x8xi32> to vector<8x8xi32>
    %c0_i32 = arith.constant 0 : i32
    %9 = arith.cmpi eq, %arg2, %c0_i32 : i32
    %10 = arith.extui %9 : i1 to i32
    %c0_i32_7 = arith.constant 0 : i32
    %11 = arith.cmpi ne, %10, %c0_i32_7 : i32
    scf.if %11 {
      %c0_40 = arith.constant 0 : index
      %c0_41 = arith.constant 0 : index
      %58 = vector.load %arg12[%c0_40, %c0_41] : memref<1x32xf32, #tpu.memory_space<vmem>>, vector<1x32xf32>
      %59 = vector.shape_cast %58 : vector<1x32xf32> to vector<1x32xf32>
      %60 = vector.broadcast %59 : vector<1x32xf32> to vector<8x32xf32>
      %c0_42 = arith.constant 0 : index
      %c0_43 = arith.constant 0 : index
      %61 = vector.load %arg23[%c0_42, %c0_43] : memref<8x32xf32, #tpu.memory_space<vmem>>, vector<8x32xf32>
      tpu.vector_store %arg23[%c0_42, %c0_43], %60 {strides = array<i32>} : memref<8x32xf32, #tpu.memory_space<vmem>>, vector<8x32xf32>,
    } else {
    }
    %c0_8 = arith.constant 0 : index
    %c0_9 = arith.constant 0 : index
    %c0_10 = arith.constant 0 : index
    %12 = vector.load %arg5[%c0_8, %c0_9, %c0_10] : memref<1x32x8xf32, #tpu.memory_space<vmem>>, vector<1x32x8xf32>
    %13 = vector.shape_cast %12 : vector<1x32x8xf32> to vector<32x8xf32>
    %cst = arith.constant dense<0.000000e+00> : vector<8x8xf32>
    %14 = tpu.matmul %4, %13, %cst {dimension_numbers = #tpu.dot_dimension_numbers<[1], [0], [0], [1], [0, 0, 1, 1], [], []>} : vector<8x32xf32>, vector<32x8xf32>, vector<8x8xf32> -> vector<8x8xf32>
    %c0_11 = arith.constant 0 : index
    %c0_12 = arith.constant 0 : index
    %c0_13 = arith.constant 0 : index
    %15 = vector.load %arg6[%c0_11, %c0_12, %c0_13] : memref<1x1x8xf32, #tpu.memory_space<vmem>>, vector<1x1x8xf32>
    %16 = vector.shape_cast %15 : vector<1x1x8xf32> to vector<1x8xf32>
    %17 = vector.broadcast %16 : vector<1x8xf32> to vector<8x8xf32>
    %18 = arith.addf %14, %17 : vector<8x8xf32>
    %cst_14 = arith.constant 0.353553385 : f32
    %19 = vector.broadcast %cst_14 : f32 to vector<8x8xf32>
    %20 = arith.mulf %18, %19 : vector<8x8xf32>
    %c0_i32_15 = arith.constant 0 : i32
    %21 = arith.cmpi eq, %arg1, %c0_i32_15 : i32
    %22 = arith.extui %21 : i1 to i32
    %c0_i32_16 = arith.constant 0 : i32
    %23 = arith.cmpi ne, %22, %c0_i32_16 : i32
    scf.if %23 {
      %c0_40 = arith.constant 0 : index
      %c0_41 = arith.constant 0 : index
      %c0_42 = arith.constant 0 : index
      %58 = vector.load %arg7[%c0_40, %c0_41, %c0_42] : memref<1x32x8xf32, #tpu.memory_space<vmem>>, vector<1x32x8xf32>
      %59 = vector.shape_cast %58 : vector<1x32x8xf32> to vector<32x8xf32>
      %cst_43 = arith.constant dense<0.000000e+00> : vector<8x8xf32>
      %60 = tpu.matmul %6, %59, %cst_43 {dimension_numbers = #tpu.dot_dimension_numbers<[1], [0], [0], [1], [0, 0, 1, 1], [], []>} : vector<8x32xf32>, vector<32x8xf32>, vector<8x8xf32> -> vector<8x8xf32>
      %c0_44 = arith.constant 0 : index
      %c0_45 = arith.constant 0 : index
      %c0_46 = arith.constant 0 : index
      %61 = vector.load %arg8[%c0_44, %c0_45, %c0_46] : memref<1x1x8xf32, #tpu.memory_space<vmem>>, vector<1x1x8xf32>
      %62 = vector.shape_cast %61 : vector<1x1x8xf32> to vector<1x8xf32>
      %63 = vector.broadcast %62 : vector<1x8xf32> to vector<8x8xf32>
      %64 = arith.addf %60, %63 : vector<8x8xf32>
      %65 = arith.index_cast %arg2 : i32 to index
      %c0_47 = arith.constant 0 : index
      %c0_48 = arith.constant 0 : index
      %66 = vector.load %arg24[%65, %c0_47, %c0_48] : memref<4x8x8xf32, #tpu.memory_space<vmem>>, vector<1x8x8xf32>
      %67 = vector.shape_cast %66 : vector<1x8x8xf32> to vector<8x8xf32>
      %68 = vector.shape_cast %64 : vector<8x8xf32> to vector<1x8x8xf32>
      tpu.vector_store %arg24[%65, %c0_47, %c0_48], %68 {strides = array<i32>} : memref<4x8x8xf32, #tpu.memory_space<vmem>>, vector<1x8x8xf32>,
      %c0_49 = arith.constant 0 : index
      %c0_50 = arith.constant 0 : index
      %c0_51 = arith.constant 0 : index
      %69 = vector.load %arg9[%c0_49, %c0_50, %c0_51] : memref<1x32x8xf32, #tpu.memory_space<vmem>>, vector<1x32x8xf32>
      %70 = vector.shape_cast %69 : vector<1x32x8xf32> to vector<32x8xf32>
      %cst_52 = arith.constant dense<0.000000e+00> : vector<8x8xf32>
      %71 = tpu.matmul %6, %70, %cst_52 {dimension_numbers = #tpu.dot_dimension_numbers<[1], [0], [0], [1], [0, 0, 1, 1], [], []>} : vector<8x32xf32>, vector<32x8xf32>, vector<8x8xf32> -> vector<8x8xf32>
      %c0_53 = arith.constant 0 : index
      %c0_54 = arith.constant 0 : index
      %c0_55 = arith.constant 0 : index
      %72 = vector.load %arg10[%c0_53, %c0_54, %c0_55] : memref<1x1x8xf32, #tpu.memory_space<vmem>>, vector<1x1x8xf32>
      %73 = vector.shape_cast %72 : vector<1x1x8xf32> to vector<1x8xf32>
      %74 = vector.broadcast %73 : vector<1x8xf32> to vector<8x8xf32>
      %75 = arith.addf %71, %74 : vector<8x8xf32>
      %76 = arith.index_cast %arg2 : i32 to index
      %c0_56 = arith.constant 0 : index
      %c0_57 = arith.constant 0 : index
      %77 = vector.load %arg25[%76, %c0_56, %c0_57] : memref<4x8x8xf32, #tpu.memory_space<vmem>>, vector<1x8x8xf32>
      %78 = vector.shape_cast %77 : vector<1x8x8xf32> to vector<8x8xf32>
      %79 = vector.shape_cast %75 : vector<8x8xf32> to vector<1x8x8xf32>
      tpu.vector_store %arg25[%76, %c0_56, %c0_57], %79 {strides = array<i32>} : memref<4x8x8xf32, #tpu.memory_space<vmem>>, vector<1x8x8xf32>,
    } else {
    }
    %24 = arith.index_cast %arg2 : i32 to index
    %c0_17 = arith.constant 0 : index
    %c0_18 = arith.constant 0 : index
    %25 = vector.load %arg24[%24, %c0_17, %c0_18] : memref<4x8x8xf32, #tpu.memory_space<vmem>>, vector<1x8x8xf32>
    %26 = vector.shape_cast %25 : vector<1x8x8xf32> to vector<8x8xf32>
    %27 = arith.index_cast %arg2 : i32 to index
    %c0_19 = arith.constant 0 : index
    %c0_20 = arith.constant 0 : index
    %28 = vector.load %arg25[%27, %c0_19, %c0_20] : memref<4x8x8xf32, #tpu.memory_space<vmem>>, vector<1x8x8xf32>
    %29 = vector.shape_cast %28 : vector<1x8x8xf32> to vector<8x8xf32>
    %cst_21 = arith.constant dense<0.000000e+00> : vector<8x8xf32>
    %30 = tpu.matmul %20, %26, %cst_21 {dimension_numbers = #tpu.dot_dimension_numbers<[1], [1], [0], [0], [0, 0, 1, 0], [], []>} : vector<8x8xf32>, vector<8x8xf32>, vector<8x8xf32> -> vector<8x8xf32>
    %c0_i32_22 = arith.constant 0 : i32
    %31 = vector.broadcast %c0_i32_22 : i32 to vector<8x8xi32>
    %32 = arith.cmpi ne, %8, %31 : vector<8x8xi32>
    %cst_23 = arith.constant -1.000000e+09 : f32
    %33 = vector.broadcast %cst_23 : f32 to vector<8x8xf32>
    %34 = arith.select %32, %33, %30 : vector<8x8xi1>, vector<8x8xf32>
    %cst_24 = arith.constant dense<0xFF800000> : vector<8xf32>
    %35 = vector.multi_reduction <maximumf>, %34, %cst_24 [1] : vector<8x8xf32> to vector<8xf32>
    %36 = vector.shape_cast %35 : vector<8xf32> to vector<8x1xf32>
    %37 = vector.broadcast %36 : vector<8x1xf32> to vector<8x8xf32>
    %38 = arith.subf %34, %37 : vector<8x8xf32>
    %39 = math.exp %38 : vector<8x8xf32>
    %cst_25 = arith.constant dense<0.000000e+00> : vector<8xf32>
    %40 = vector.multi_reduction <add>, %39, %cst_25 [1] : vector<8x8xf32> to vector<8xf32>
    %41 = vector.shape_cast %40 : vector<8xf32> to vector<8x1xf32>
    %42 = tpu.reciprocal %41 {approx = true} : vector<8x1xf32> -> vector<8x1xf32>
    %43 = vector.broadcast %42 : vector<8x1xf32> to vector<8x8xf32>
    %44 = arith.mulf %39, %43 : vector<8x8xf32>
    %c0_26 = arith.constant 0 : index
    %c0_27 = arith.constant 0 : index
    %c0_28 = arith.constant 0 : index
    %c0_29 = arith.constant 0 : index
    %45 = vector.load %arg22[%c0_26, %c0_27, %c0_28, %c0_29] : memref<1x1x8x8xf32, #tpu.memory_space<vmem>>, vector<1x1x8x8xf32>
    %46 = vector.shape_cast %45 : vector<1x1x8x8xf32> to vector<8x8xf32>
    %47 = vector.shape_cast %44 : vector<8x8xf32> to vector<1x1x8x8xf32>
    tpu.vector_store %arg22[%c0_26, %c0_27, %c0_28, %c0_29], %47 {strides = array<i32>} : memref<1x1x8x8xf32, #tpu.memory_space<vmem>>, vector<1x1x8x8xf32>,
    %c0_30 = arith.constant 0 : index
    %c0_31 = arith.constant 0 : index
    %48 = vector.load %arg23[%c0_30, %c0_31] : memref<8x32xf32, #tpu.memory_space<vmem>>, vector<8x32xf32>
    %cst_32 = arith.constant dense<0.000000e+00> : vector<8x8xf32>
    %49 = tpu.matmul %44, %29, %cst_32 {dimension_numbers = #tpu.dot_dimension_numbers<[1], [0], [0], [1], [0, 0, 1, 1], [], []>} : vector<8x8xf32>, vector<8x8xf32>, vector<8x8xf32> -> vector<8x8xf32>
    %c0_33 = arith.constant 0 : index
    %c0_34 = arith.constant 0 : index
    %c0_35 = arith.constant 0 : index
    %50 = vector.load %arg11[%c0_33, %c0_34, %c0_35] : memref<1x8x32xf32, #tpu.memory_space<vmem>>, vector<1x8x32xf32>
    %51 = vector.shape_cast %50 : vector<1x8x32xf32> to vector<8x32xf32>
    %cst_36 = arith.constant dense<0.000000e+00> : vector<8x32xf32>
    %52 = tpu.matmul %49, %51, %cst_36 {dimension_numbers = #tpu.dot_dimension_numbers<[1], [0], [0], [1], [0, 0, 1, 1], [], []>} : vector<8x8xf32>, vector<8x32xf32>, vector<8x32xf32> -> vector<8x32xf32>
    %53 = arith.addf %48, %52 : vector<8x32xf32>
    %c0_37 = arith.constant 0 : index
    %c0_38 = arith.constant 0 : index
    %54 = vector.load %arg23[%c0_37, %c0_38] : memref<8x32xf32, #tpu.memory_space<vmem>>, vector<8x32xf32>
    tpu.vector_store %arg23[%c0_37, %c0_38], %53 {strides = array<i32>} : memref<8x32xf32, #tpu.memory_space<vmem>>, vector<8x32xf32>,
    %c3_i32 = arith.constant 3 : i32
    %55 = arith.cmpi eq, %arg2, %c3_i32 : i32
    %56 = arith.extui %55 : i1 to i32
    %c0_i32_39 = arith.constant 0 : i32
    %57 = arith.cmpi ne, %56, %c0_i32_39 : i32
    scf.if %57 {
      %c0_40 = arith.constant 0 : index
      %c0_41 = arith.constant 0 : index
      %58 = vector.load %arg23[%c0_40, %c0_41] : memref<8x32xf32, #tpu.memory_space<vmem>>, vector<8x32xf32>
      %59 = arith.addf %4, %58 : vector<8x32xf32>
      %c0_42 = arith.constant 0 : index
      %c0_43 = arith.constant 0 : index
      %60 = vector.load %arg13[%c0_42, %c0_43] : memref<1x32xf32, #tpu.memory_space<vmem>>, vector<1x32xf32>
      %c0_44 = arith.constant 0 : index
      %c0_45 = arith.constant 0 : index
      %61 = vector.load %arg14[%c0_44, %c0_45] : memref<1x32xf32, #tpu.memory_space<vmem>>, vector<1x32xf32>
      %cst_46 = arith.constant dense<0.000000e+00> : vector<8xf32>
      %62 = vector.multi_reduction <add>, %59, %cst_46 [1] : vector<8x32xf32> to vector<8xf32>
      %63 = vector.shape_cast %62 : vector<8xf32> to vector<8x1xf32>
      %cst_47 = arith.constant 3.200000e+01 : f32
      %64 = vector.broadcast %cst_47 : f32 to vector<8x1xf32>
      %65 = arith.divf %63, %64 : vector<8x1xf32>
      %66 = vector.broadcast %65 : vector<8x1xf32> to vector<8x32xf32>
      %67 = arith.subf %59, %66 : vector<8x32xf32>
      %68 = arith.mulf %67, %67 : vector<8x32xf32>
      %cst_48 = arith.constant dense<0.000000e+00> : vector<8xf32>
      %69 = vector.multi_reduction <add>, %68, %cst_48 [1] : vector<8x32xf32> to vector<8xf32>
      %70 = vector.shape_cast %69 : vector<8xf32> to vector<8x1xf32>
      %cst_49 = arith.constant 3.200000e+01 : f32
      %71 = vector.broadcast %cst_49 : f32 to vector<8x1xf32>
      %72 = arith.divf %70, %71 : vector<8x1xf32>
      %73 = vector.broadcast %65 : vector<8x1xf32> to vector<8x32xf32>
      %74 = arith.subf %59, %73 : vector<8x32xf32>
      %cst_50 = arith.constant 9.99999974E-6 : f32
      %75 = vector.broadcast %cst_50 : f32 to vector<8x1xf32>
      %76 = arith.addf %72, %75 : vector<8x1xf32>
      %77 = math.rsqrt %76 : vector<8x1xf32>
      %78 = vector.broadcast %77 : vector<8x1xf32> to vector<8x32xf32>
      %79 = arith.mulf %74, %78 : vector<8x32xf32>
      %80 = vector.broadcast %60 : vector<1x32xf32> to vector<8x32xf32>
      %81 = arith.mulf %79, %80 : vector<8x32xf32>
      %82 = vector.broadcast %61 : vector<1x32xf32> to vector<8x32xf32>
      %83 = arith.addf %81, %82 : vector<8x32xf32>
      %c0_51 = arith.constant 0 : index
      %c0_52 = arith.constant 0 : index
      %84 = vector.load %arg15[%c0_51, %c0_52] : memref<32x64xf32, #tpu.memory_space<vmem>>, vector<32x64xf32>
      %cst_53 = arith.constant dense<0.000000e+00> : vector<8x64xf32>
      %85 = tpu.matmul %83, %84, %cst_53 {dimension_numbers = #tpu.dot_dimension_numbers<[1], [0], [0], [1], [0, 0, 1, 1], [], []>} : vector<8x32xf32>, vector<32x64xf32>, vector<8x64xf32> -> vector<8x64xf32>
      %c0_54 = arith.constant 0 : index
      %c0_55 = arith.constant 0 : index
      %86 = vector.load %arg16[%c0_54, %c0_55] : memref<1x64xf32, #tpu.memory_space<vmem>>, vector<1x64xf32>
      %87 = vector.broadcast %86 : vector<1x64xf32> to vector<8x64xf32>
      %88 = arith.addf %85, %87 : vector<8x64xf32>
      %cst_56 = arith.constant 5.000000e-01 : f32
      %89 = vector.broadcast %cst_56 : f32 to vector<8x64xf32>
      %90 = arith.mulf %89, %88 : vector<8x64xf32>
      %cst_57 = arith.constant 4.471500e-02 : f32
      %91 = vector.broadcast %cst_57 : f32 to vector<8x64xf32>
      %92 = arith.mulf %91, %88 : vector<8x64xf32>
      %93 = arith.mulf %92, %88 : vector<8x64xf32>
      %94 = arith.mulf %93, %88 : vector<8x64xf32>
      %95 = arith.addf %88, %94 : vector<8x64xf32>
      %cst_58 = arith.constant 0.797884583 : f32
      %96 = vector.broadcast %cst_58 : f32 to vector<8x64xf32>
      %97 = arith.mulf %96, %95 : vector<8x64xf32>
      %98 = math.tanh %97 : vector<8x64xf32>
      %cst_59 = arith.constant 1.000000e+00 : f32
      %99 = vector.broadcast %cst_59 : f32 to vector<8x64xf32>
      %100 = arith.addf %99, %98 : vector<8x64xf32>
      %101 = arith.mulf %90, %100 : vector<8x64xf32>
      %c0_60 = arith.constant 0 : index
      %c0_61 = arith.constant 0 : index
      %102 = vector.load %arg17[%c0_60, %c0_61] : memref<64x32xf32, #tpu.memory_space<vmem>>, vector<64x32xf32>
      %cst_62 = arith.constant dense<0.000000e+00> : vector<8x32xf32>
      %103 = tpu.matmul %101, %102, %cst_62 {dimension_numbers = #tpu.dot_dimension_numbers<[1], [0], [0], [1], [0, 0, 1, 1], [], []>} : vector<8x64xf32>, vector<64x32xf32>, vector<8x32xf32> -> vector<8x32xf32>
      %c0_63 = arith.constant 0 : index
      %c0_64 = arith.constant 0 : index
      %104 = vector.load %arg18[%c0_63, %c0_64] : memref<1x32xf32, #tpu.memory_space<vmem>>, vector<1x32xf32>
      %105 = vector.broadcast %104 : vector<1x32xf32> to vector<8x32xf32>
      %106 = arith.addf %103, %105 : vector<8x32xf32>
      %107 = arith.addf %83, %106 : vector<8x32xf32>
      %c0_65 = arith.constant 0 : index
      %c0_66 = arith.constant 0 : index
      %108 = vector.load %arg19[%c0_65, %c0_66] : memref<1x32xf32, #tpu.memory_space<vmem>>, vector<1x32xf32>
      %c0_67 = arith.constant 0 : index
      %c0_68 = arith.constant 0 : index
      %109 = vector.load %arg20[%c0_67, %c0_68] : memref<1x32xf32, #tpu.memory_space<vmem>>, vector<1x32xf32>
      %cst_69 = arith.constant dense<0.000000e+00> : vector<8xf32>
      %110 = vector.multi_reduction <add>, %107, %cst_69 [1] : vector<8x32xf32> to vector<8xf32>
      %111 = vector.shape_cast %110 : vector<8xf32> to vector<8x1xf32>
      %cst_70 = arith.constant 3.200000e+01 : f32
      %112 = vector.broadcast %cst_70 : f32 to vector<8x1xf32>
      %113 = arith.divf %111, %112 : vector<8x1xf32>
      %114 = vector.broadcast %113 : vector<8x1xf32> to vector<8x32xf32>
      %115 = arith.subf %107, %114 : vector<8x32xf32>
      %116 = arith.mulf %115, %115 : vector<8x32xf32>
      %cst_71 = arith.constant dense<0.000000e+00> : vector<8xf32>
      %117 = vector.multi_reduction <add>, %116, %cst_71 [1] : vector<8x32xf32> to vector<8xf32>
      %118 = vector.shape_cast %117 : vector<8xf32> to vector<8x1xf32>
      %cst_72 = arith.constant 3.200000e+01 : f32
      %119 = vector.broadcast %cst_72 : f32 to vector<8x1xf32>
      %120 = arith.divf %118, %119 : vector<8x1xf32>
      %121 = vector.broadcast %113 : vector<8x1xf32> to vector<8x32xf32>
      %122 = arith.subf %107, %121 : vector<8x32xf32>
      %cst_73 = arith.constant 9.99999974E-6 : f32
      %123 = vector.broadcast %cst_73 : f32 to vector<8x1xf32>
      %124 = arith.addf %120, %123 : vector<8x1xf32>
      %125 = math.rsqrt %124 : vector<8x1xf32>
      %126 = vector.broadcast %125 : vector<8x1xf32> to vector<8x32xf32>
      %127 = arith.mulf %122, %126 : vector<8x32xf32>
      %128 = vector.broadcast %108 : vector<1x32xf32> to vector<8x32xf32>
      %129 = arith.mulf %127, %128 : vector<8x32xf32>
      %130 = vector.broadcast %109 : vector<1x32xf32> to vector<8x32xf32>
      %131 = arith.addf %129, %130 : vector<8x32xf32>
      %c0_74 = arith.constant 0 : index
      %c0_75 = arith.constant 0 : index
      %c0_76 = arith.constant 0 : index
      %132 = vector.load %arg21[%c0_74, %c0_75, %c0_76] : memref<1x8x32xf32, #tpu.memory_space<vmem>>, vector<1x8x32xf32>
      %133 = vector.shape_cast %132 : vector<1x8x32xf32> to vector<8x32xf32>
      %134 = vector.shape_cast %131 : vector<8x32xf32> to vector<1x8x32xf32>
      tpu.vector_store %arg21[%c0_74, %c0_75, %c0_76], %134 {strides = array<i32>} : memref<1x8x32xf32, #tpu.memory_space<vmem>>, vector<1x8x32xf32>,
    } else {
    }
    return
  }
  func.func @transform_0(%arg0: i32, %arg1: i32, %arg2: i32) -> (i32, i32, i32) {
    %c0_i32 = arith.constant 0 : i32
    %c0_i32_0 = arith.constant 0 : i32
    %c0_i32_1 = arith.constant 0 : i32
    return %arg0, %c0_i32, %c0_i32_0 : i32, i32, i32
  }
  func.func @transform_1(%arg0: i32, %arg1: i32, %arg2: i32) -> (i32, i32, i32) {
    %c0_i32 = arith.constant 0 : i32
    %c0_i32_0 = arith.constant 0 : i32
    return %arg0, %arg1, %c0_i32 : i32, i32, i32
  }
  func.func @transform_2(%arg0: i32, %arg1: i32, %arg2: i32) -> (i32, i32, i32) {
    %c0_i32 = arith.constant 0 : i32
    %c0_i32_0 = arith.constant 0 : i32
    %c0_i32_1 = arith.constant 0 : i32
    return %arg2, %c0_i32, %c0_i32_0 : i32, i32, i32
  }
  func.func @transform_3(%arg0: i32, %arg1: i32, %arg2: i32) -> (i32, i32, i32) {
    %c0_i32 = arith.constant 0 : i32
    %c0_i32_0 = arith.constant 0 : i32
    %c0_i32_1 = arith.constant 0 : i32
    return %arg2, %c0_i32, %c0_i32_0 : i32, i32, i32
  }
  func.func @transform_4(%arg0: i32, %arg1: i32, %arg2: i32) -> (i32, i32, i32) {
    %c0_i32 = arith.constant 0 : i32
    %c0_i32_0 = arith.constant 0 : i32
    %c0_i32_1 = arith.constant 0 : i32
    return %arg2, %c0_i32, %c0_i32_0 : i32, i32, i32
  }
  func.func @transform_5(%arg0: i32, %arg1: i32, %arg2: i32) -> (i32, i32, i32) {
    %c0_i32 = arith.constant 0 : i32
    %c0_i32_0 = arith.constant 0 : i32
    %c0_i32_1 = arith.constant 0 : i32
    return %arg2, %c0_i32, %c0_i32_0 : i32, i32, i32
  }
  func.func @transform_6(%arg0: i32, %arg1: i32, %arg2: i32) -> (i32, i32, i32) {
    %c0_i32 = arith.constant 0 : i32
    %c0_i32_0 = arith.constant 0 : i32
    %c0_i32_1 = arith.constant 0 : i32
    return %arg2, %c0_i32, %c0_i32_0 : i32, i32, i32
  }
  func.func @transform_7(%arg0: i32, %arg1: i32, %arg2: i32) -> (i32, i32, i32) {
    %c0_i32 = arith.constant 0 : i32
    %c0_i32_0 = arith.constant 0 : i32
    %c0_i32_1 = arith.constant 0 : i32
    return %arg2, %c0_i32, %c0_i32_0 : i32, i32, i32
  }
  func.func @transform_8(%arg0: i32, %arg1: i32, %arg2: i32) -> (i32, i32, i32) {
    %c0_i32 = arith.constant 0 : i32
    %c0_i32_0 = arith.constant 0 : i32
    %c0_i32_1 = arith.constant 0 : i32
    return %arg2, %c0_i32, %c0_i32_0 : i32, i32, i32
  }
  func.func @transform_9(%arg0: i32, %arg1: i32, %arg2: i32) -> (i32, i32) {
    %c0_i32 = arith.constant 0 : i32
    %c0_i32_0 = arith.constant 0 : i32
    %c0_i32_1 = arith.constant 0 : i32
    return %c0_i32, %c0_i32_0 : i32, i32
  }
  func.func @transform_10(%arg0: i32, %arg1: i32, %arg2: i32) -> (i32, i32) {
    %c0_i32 = arith.constant 0 : i32
    %c0_i32_0 = arith.constant 0 : i32
    %c0_i32_1 = arith.constant 0 : i32
    return %c0_i32, %c0_i32_0 : i32, i32
  }
  func.func @transform_11(%arg0: i32, %arg1: i32, %arg2: i32) -> (i32, i32) {
    %c0_i32 = arith.constant 0 : i32
    %c0_i32_0 = arith.constant 0 : i32
    %c0_i32_1 = arith.constant 0 : i32
    return %c0_i32, %c0_i32_0 : i32, i32
  }
  func.func @transform_12(%arg0: i32, %arg1: i32, %arg2: i32) -> (i32, i32) {
    %c0_i32 = arith.constant 0 : i32
    %c0_i32_0 = arith.constant 0 : i32
    %c0_i32_1 = arith.constant 0 : i32
    return %c0_i32, %c0_i32_0 : i32, i32
  }
  func.func @transform_13(%arg0: i32, %arg1: i32, %arg2: i32) -> (i32, i32) {
    %c0_i32 = arith.constant 0 : i32
    %c0_i32_0 = arith.constant 0 : i32
    %c0_i32_1 = arith.constant 0 : i32
    return %c0_i32, %c0_i32_0 : i32, i32
  }
  func.func @transform_14(%arg0: i32, %arg1: i32, %arg2: i32) -> (i32, i32) {
    %c0_i32 = arith.constant 0 : i32
    %c0_i32_0 = arith.constant 0 : i32
    %c0_i32_1 = arith.constant 0 : i32
    return %c0_i32, %c0_i32_0 : i32, i32
  }
  func.func @transform_15(%arg0: i32, %arg1: i32, %arg2: i32) -> (i32, i32) {
    %c0_i32 = arith.constant 0 : i32
    %c0_i32_0 = arith.constant 0 : i32
    %c0_i32_1 = arith.constant 0 : i32
    return %c0_i32, %c0_i32_0 : i32, i32
  }
  func.func @transform_16(%arg0: i32, %arg1: i32, %arg2: i32) -> (i32, i32) {
    %c0_i32 = arith.constant 0 : i32
    %c0_i32_0 = arith.constant 0 : i32
    %c0_i32_1 = arith.constant 0 : i32
    return %c0_i32, %c0_i32_0 : i32, i32
  }
  func.func @transform_17(%arg0: i32, %arg1: i32, %arg2: i32) -> (i32, i32) {
    %c0_i32 = arith.constant 0 : i32
    %c0_i32_0 = arith.constant 0 : i32
    %c0_i32_1 = arith.constant 0 : i32
    return %c0_i32, %c0_i32_0 : i32, i32
  }
  func.func @transform_18(%arg0: i32, %arg1: i32, %arg2: i32) -> (i32, i32, i32) {
    %c0_i32 = arith.constant 0 : i32
    %c0_i32_0 = arith.constant 0 : i32
    return %arg0, %arg1, %c0_i32 : i32, i32, i32
  }
  func.func @transform_19(%arg0: i32, %arg1: i32, %arg2: i32) -> (i32, i32, i32, i32) {
    %c0_i32 = arith.constant 0 : i32
    %c0_i32_0 = arith.constant 0 : i32
    return %arg0, %arg2, %arg1, %c0_i32 : i32, i32, i32, i32
  }
}

</mosaic_0001>

<bundles_post_ra>
// kernel: tpu_custom_call.1
= control target key start
LH: loop header
LB: loop body
LE: loop exit
PB: predicated region body
PF: predicated region fallthrough
CT: control target
= control target key end

     0   :  { %s2738_s0 = inlined_call_operand.vmem [shape: f32[2,8,32], index: 0, kind: input, shape index: {}]   ;;  %s2739_s1 = inlined_call_operand.vmem [shape: s32[2,8,8], index: 1, kind: input, shape index: {}]   ;;  %s2740_s2 = inlined_call_operand.vmem [shape: f32[4,32,8], index: 2, kind: input, shape index: {}]   ;;  %s2741_s3 = inlined_call_operand.vmem [shape: f32[4,1,8], index: 3, kind: input, shape index: {}]   ;;  %s2742_s4 = inlined_call_operand.vmem [shape: f32[4,32,8], index: 4, kind: input, shape index: {}]   ;;  %s2743_s5 = inlined_call_operand.vmem [shape: f32[4,1,8], index: 5, kind: input, shape index: {}]   ;;  %s2744_s6 = inlined_call_operand.vmem [shape: f32[4,32,8], index: 6, kind: input, shape index: {}]   ;;  %s2745_s7 = inlined_call_operand.vmem [shape: f32[4,1,8], index: 7, kind: input, shape index: {}]   ;;  %s2746_s8 = inlined_call_operand.vmem [shape: f32[4,8,32], index: 8, kind: input, shape index: {}]   ;;  %s2747_s9 = inlined_call_operand.vmem [shape: f32[1,32], index: 9, kind: input, shape index: {}]   ;;  %s2748_s10 = inlined_call_operand.vmem [shape: f32[1,32], index: 10, kind: input, shape index: {}]   ;;  %s2749_s11 = inlined_call_operand.vmem [shape: f32[1,32], index: 11, kind: input, shape index: {}]   ;;  %s2750_s12 = inlined_call_operand.vmem [shape: f32[32,64], index: 12, kind: input, shape index: {}]   ;;  %s2751_s13 = inlined_call_operand.vmem [shape: f32[1,64], index: 13, kind: input, shape index: {}]   ;;  %s2752_s14 = inlined_call_operand.vmem [shape: f32[64,32], index: 14, kind: input, shape index: {}]   ;;  %s2753_s15 = inlined_call_operand.vmem [shape: f32[1,32], index: 15, kind: input, shape index: {}]   ;;  %s2754_s16 = inlined_call_operand.vmem [shape: f32[1,32], index: 16, kind: input, shape index: {}]   ;;  %s2755_s17 = inlined_call_operand.vmem [shape: f32[1,32], index: 17, kind: input, shape index: {}]   ;;  %s2756_s18 = inlined_call_operand.hbm [shape: f32[2,8,32], index: 18, kind: output, shape index: {0}]   ;;  %s2757_s19 = inlined_call_operand.hbm [shape: f32[2,4,8,8], index: 19, kind: output, shape index: {1}]  }
   0x1   :  { %2783 = sst [smem:[#allocation29_spill]] %s2738_s0 }
   0x2   :  { %2784 = sst [smem:[#allocation30_spill]] %s2739_s1 }
   0x3   :  { %2785 = sst [smem:[#allocation31_spill]] %s2740_s2 }
   0x4   :  { %2786 = sst [smem:[#allocation32_spill]] %s2741_s3 }
   0x5   :  { %2787 = sst [smem:[#allocation33_spill]] %s2742_s4 }
   0x6   :  { %2788 = sst [smem:[#allocation34_spill]] %s2743_s5 }
   0x7   :  { %2789 = sst [smem:[#allocation35_spill]] %s2744_s6 }
   0x8   :  { %2790 = sst [smem:[#allocation36_spill]] %s2751_s13 }
   0x9   :  { %2791 = sst [smem:[#allocation37_spill]] %s2752_s14 }
   0xa   :  { %2792 = sst [smem:[#allocation38_spill]] %s2753_s15 }
   0xb   :  { %2793 = sst [smem:[#allocation39_spill]] %s2754_s16 }
   0xc   :  { %2794 = sst [smem:[#allocation40_spill]] %s2755_s17 }
   0xd   :  { %2795 = sst [smem:[#allocation41_spill]] %s2756_s18 }
   0xe   :  { %2796 = sst [smem:[#allocation42_spill]] %s2757_s19 }
   0xf   :  { %25 = vsyncpa [#allocation6], 0 }
  0x10   :  { %27 = vsyncpa [#allocation6 + $0x1], 0 }
  0x11   :  { %28 = vsyncpa [#allocation8], 0 }
  0x12   :  { %30 = vsyncpa [#allocation8 + $0x1], 0  ;;  %s2330_s0 = smov 0   ;;  %s2332_s30 = smov 0  }
  0x13   :  { %s2334_s20 = smov 0   ;;  %s2336_s21 = smov 0  }
  0x14   :  { %s2338_s1 = smov 0   ;;  %s2340_s22 = smov 0  }
  0x15   :  { %s2342_s2 = smov 0   ;;  %s2344_s23 = smov 0  }
  0x16   :  { %s2346_s24 = smov 0   ;;  %s2348_s25 = smov 0  }
  0x17   :  { %s2350_s3 = smov 0  }
  0x18 LB: > { %2797 = sst [smem:[#allocation11_spill]] %s2182_s0  ;;  %s1800_s26 = sadd.s32 4294967295, %s2222_s3   ;;  %s2222_s3 = sphi %s2350_s3, %s36_s3   ;;  %s2218_s25 = sphi %s2348_s25, %s2863_s25   ;;  %s2214_s24 = sphi %s2346_s24, %s2862_s24   ;;  %s2210_s23 = sphi %s2344_s23, %s2861_s23   ;;  %s2206_s2 = sphi %s2342_s2, %s2860_s2   ;;  %s2202_s22 = sphi %s2340_s22, %s2859_s22   ;;  %s2198_s1 = sphi %s2338_s1, %s2858_s1   ;;  %s2194_s21 = sphi %s2336_s21, %s2857_s21   ;;  %s2190_s20 = sphi %s2334_s20, %s2856_s20   ;;  %s2186_s30 = sphi %s2332_s30, %s2855_s30   ;;  %s2182_s0 = sphi %s2330_s0, %s2854_s0  }
  0x19   : > { %2798 = sst [smem:[#allocation12_spill]] %s2186_s30  ;;  %s1801_s27 = sadd.s32 4294967294, %s2222_s3  }
  0x1a   : > { %2799 = sst [smem:[#allocation13_spill]] %s2190_s20  ;;  %s48_s28 = sadd.s32 1, %s2214_s24 }
  0x1b   : > { %2800 = sst [smem:[#allocation14_spill]] %s2194_s21  ;;  %s55_s29 = sadd.s32 1, %s2218_s25 }
  0x1c   : > { %2801 = sst [smem:[#allocation15_spill]] %s2198_s1  ;;  %p49_p0 = scmp.ge.s32.totalorder %s48_s28, 4 }
  0x1d   : > { %2802 = sst [smem:[#allocation16_spill]] %s2202_s22  ;;  %s489_s19 = sadd.s32 1, %s2202_s22 }
  0x1e   : > { %2803 = sst [smem:[#allocation17_spill]] %s2210_s23  ;;  %p499_p1 = scmp.ne.s32.totalorder %s2202_s22, %s2198_s1 }
  0x1f   : > { %2804 = sst [smem:[#allocation18_spill]] %s2214_s24  ;;  %p2392_p2 = scmp.eq.s32.totalorder %s1800_s26, 7 }
  0x20   : > { %2805 = sst [smem:[#allocation19_spill]] %s2218_s25  ;;  %s2865_s28 = smov (%p49_p0, %s48_s28), 0 }
  0x21   : > { %2806 = sst [smem:[#allocation20_spill]] %s2222_s3  ;;  %s2867_s29 = smov (!%p49_p0, %s55_s29), %s2218_s25 }
  0x22   : > { %2808 = sst [smem:[#allocation21_spill]] %s2865_s28  ;;  %p2401_p3 = por %p2392_p2, %p499_p1 }
  0x23   : > { %p505_p4 = scmp.ne.s32.totalorder %s2198_s1, %s2194_s21  ;;  %p57_p5 = scmp.ge.s32.totalorder %s2867_s29, 2 }
  0x24   : > { %s2809_s17 = scalar_select %p2401_p3, 1, 0 }
  0x25   : > { %p2407_p6 = scmp.eq.s32.totalorder %s1801_s27, 7  ;;  %s513_s16 = ssub.s32 %s2214_s24, %s2865_s28 }
  0x26   : > { %2810 = sst [smem:[#allocation22_spill]] %s2809_s17  ;;  %s519_s15 = sadd.s32 1, %s2190_s20 }
  0x27   : > { %s2869_s29 = smov (%p57_p5, %s2867_s29), 0  ;;  %p2418_p7 = por %p2407_p6, %p505_p4 }
  0x28   : > { %2812 = sst [smem:[#allocation23_spill]] %s2869_s29  ;;  %p529_p8 = scmp.ne.s32.totalorder %s2190_s20, %s2186_s30 }
  0x29   : > { %s2813_s13 = scalar_select %p2418_p7, 1, 0 }
  0x2a   : > { %s484_s21 = ssub.s32 %s2218_s25, %s2869_s29  ;;  %p535_p9 = scmp.ne.s32.totalorder %s2186_s30, %s2182_s0 }
  0x2b   : > { %2814 = sst [smem:[#allocation24_spill]] %s2813_s13  ;;  %p487_p10 = scmp.eq.s32.totalorder %s484_s21, 0 }
  0x2c   : > { %s514_s27 = sor.u32 %s513_s16, %s484_s21  ;;  %p2430_p12 = por %p529_p8, %p2392_p2 }
  0x2d   : > { %p517_p11 = scmp.eq.s32.totalorder %s514_s27, 0  ;;  %p2442_p13 = por %p535_p9, %p2407_p6 }
  0x2e   : > { %s2815_s17 = scalar_select %p2430_p12, 1, 0 }
  0x2f   : > { %s2435_s28 = scalar_select %p487_p10, %s2202_s22, %s489_s19  }
  0x30   : > { %2816 = sst [smem:[#allocation25_spill]] %s2815_s17  ;;  %p1804_p0 = scmp.ge.s32.totalorder %s2222_s3, 1 }
  0x31   : > { %2817 = sst [smem:[#allocation26_spill]] %s2435_s28  ;;  %p647_p1 = scmp.lt.s32.totalorder %s2222_s3, 9 }
  0x32   : > { %s2438_s24 = scalar_select %p517_p11, %s2190_s20, %s519_s15  }
  0x33   : > { %s2819_s14 = scalar_select %p2442_p13, 1, 0 }
  0x34   : > { %2818 = sst [smem:[#allocation27_spill]] %s2438_s24  ;;  %p648_p4 = pnand %p1804_p0, %p647_p1 }
  0x35   : > { %2820 = sst [smem:[#allocation28_spill]] %s2819_s14  ;;  %s2768_s16 = sand.u32 (!%p648_p4), 1, %s2198_s1  }
  0x36   : > { %651 = sbr.rel (%p648_p4) target bundleno = 2281 (0x8e9), region = 92  ;;  %s2770_s15 = sand.u32 (!%p648_p4), 1, %s2186_s30  }
  0x37   : > { %s2452_s18 = sshll.u32 (!%p648_p4), %s2768_s16, 3  ;;  %s2456_s19 = sshll.u32 (!%p648_p4), %s2770_s15, 3 }
  0x38   : > { %p742_p2 = scmp.lt.s32.totalorder (!%p648_p4), %s2210_s23, 1  ;;  %p753_p5 = scmp.lt.s32.totalorder (!%p648_p4), %s2206_s2, 3 }
  0x39   : > { %s2821_s16 = sld [smem:[#allocation29_spill]] (!%p648_p4)  ;;  %s734_s29 = scalar_lea.vmem (!%p648_p4), [#allocation5], %s2452_s18 }
  0x3a   : > { %s2822_s24 = sld [smem:[#allocation30_spill]] (!%p648_p4)  ;;  %s741_s17 = scalar_lea.vmem (!%p648_p4), [#allocation7], %s2456_s19 }
  0x3b   : > { %s743_s21 = scalar_select %p742_p2, %s2210_s23, 1 }
  0x3c   : > { %s2462_s26 = scalar_select %p753_p5, %s2206_s2, 3 }
  0x3d   : > { %s1807_s27 = sshll.u32 %s743_s21, 3  ;;  %s2824_s21 = sld [smem:[#allocation31_spill]] }
  0x3e   : > { %s1846_s14 = sshll.u32 %s2462_s26, 5  ;;  %s2825_s4 = sld [smem:[#allocation33_spill]] }
  0x3f   : > { %s745_s28 = scalar_lea.vmem %s2821_s16, %s1807_s27  ;;  %s2826_s5 = sld [smem:[#allocation34_spill]] }
  0x40   : > { %s752_s20 = scalar_lea.vmem %s2822_s24, %s1807_s27  ;;  %v2475_v0 = vld [vmem:[%s745_s28] sm:$0xff]  ;;  %s2827_s6 = sld [smem:[#allocation35_spill]] }
  0x41   : > { %v2477_v1 = vld [vmem:[%s752_s20] sm:$0xff]  ;;  %s776_s30 = scalar_lea.vmem %s2745_s7, %s2462_s26  ;;  %s1815_s1 = sshll.u32 %s2462_s26, 3 }
  0x42   : > { %s2506_s25 = scalar_lea.vmem %s2746_s8, %s1815_s1  ;;  %p1816_p6 = scmp.ne.s32.totalorder %s2206_s2, 0 }
  0x43   : > { %s2482_s23 = scalar_lea.vmem %s2824_s21, %s1846_s14 }
  0x44   : > { %s2487_s16 = scalar_lea.vmem %s2825_s4, %s1846_s14  ;;  %789 = sbr.rel (%p1816_p6) target bundleno = 75 (0x4b), region = 96 }
  0x45   : > { %s768_s15 = scalar_lea.vmem %s2826_s5, %s2462_s26 }
  0x46   : > { %s2496_s3 = scalar_lea.vmem %s2827_s6, %s1846_s14 }
  0x49   : > { %v1817_v2 = vld [vmem:[%s2747_s9] ss:$0 sm:$0xff]  ;;  %vm797_vm0 = vcmask 261120  }
  0x4a   : > { %798 = vst.msk [vmem:[#allocation2] sm:$0xff] %vm797_vm0, %v1817_v2 }
  0x4b PF: > { %v892_v3 = vld [vmem:[%s2487_s16 + $0x18] sm:$0xff]  ;;  %v2224_v4 = vmov 0.0   ;;  %v891_v5 = vld [vmem:[%s2487_s16 + $0x10] sm:$0xff]  ;;  %vm2225_vm1 = vmmov 0   ;;  %v890_v8 = vld [vmem:[%s2487_s16 + $0x8] sm:$0xff]  ;;  %vm810_vm2 = vcmask 261120  }
  0x4c   : > { %1895 = vmatprep.subr.mxu1 %v2224_v4  ;;  %1903 = vmatprep.mubr.msk.f32.mxu1 %vm2225_vm1, %v2224_v4  ;;  %v802_v6 = vld [vmem:[%s2482_s23 + $0x18] sm:$0xff]  ;;  %v801_v7 = vld [vmem:[%s2482_s23 + $0x10] sm:$0xff]  ;;  %v800_v9 = vld [vmem:[%s2482_s23 + $0x8] sm:$0xff]  ;;  %s1822_s14 = sshll.u32 %s2206_s2, 3  ;;  %vm975_vm3 = vcmask 64512   ;;  %s2829_s28 = sld [smem:[#allocation32_spill]] }
  0x4d   : > { %1896 = vmatpush3.msra.mxu1 %v892_v3  ;;  %1884 = vmatprep.subr.mxu0 %v2224_v4  ;;  %v889_v10 = vld [vmem:[%s2487_s16] sm:$0xff]  ;;  %s974_s13 = scalar_lea.vmem [#allocation3], %s1822_s14  ;;  %v980_v22 = vld [vmem:[%s2496_s3 + $0x18] sm:$0xff]  ;;  %v979_v23 = vld [vmem:[%s2496_s3 + $0x10] sm:$0xff]  ;;  %vm1142_vm4 = vcmp.ne.s32.totalorder %v2477_v1, 0  ;;  %s1058_s27 = scalar_lea.vmem [#allocation4], %s1822_s14 }
  0x4e   : > { %1897 = vmatprep.subr.mxu1 %v2224_v4  ;;  %1885 = vmatpush3.msra.mxu0 %v802_v6  ;;  %v799_v11 = vld [vmem:[%s2482_s23] sm:$0xff]  ;;  %v978_v24 = vld [vmem:[%s2496_s3 + $0x8] sm:$0xff]  ;;  %p1830_p8 = scmp.ne.s32.totalorder %s2206_s2, 3 }
  0x4f   : > { %1898 = vmatpush3.msra.mxu1 %v891_v5  ;;  %1886 = vmatprep.subr.mxu0 %v2224_v4  ;;  %v1820_v12 = vld [vmem:[%s768_s15] ss:$0 sm:$0xff]  ;;  %s2831_s15 = sld [smem:[#allocation37_spill]] (!%p1830_p8) }
  0x50   : > { %1899 = vmatprep.subr.mxu1 %v2224_v4  ;;  %1887 = vmatpush3.msra.mxu0 %v801_v7  ;;  %v977_v25 = vld [vmem:[%s2496_s3] sm:$0xff]  ;;  %s2832_s3 = sld [smem:[#allocation36_spill]] (!%p1830_p8) }
  0x51   : > { %1900 = vmatpush3.msra.mxu1 %v890_v8  ;;  %1888 = vmatprep.subr.mxu0 %v2224_v4  ;;  %v1823_v35 = vld [vmem:[%s776_s30] ss:$0 sm:$0xff]  ;;  %s2833_s30 = sld [smem:[#allocation38_spill]] (!%p1830_p8) }
  0x52   : > { %1901 = vmatprep.subr.mxu1 %v2224_v4  ;;  %1889 = vmatpush3.msra.mxu0 %v800_v9  ;;  %s2830_s1 = scalar_lea.vmem %s2829_s28, %s2462_s26  ;;  %v1230_v40 = vld [vmem:[%s2506_s25] sm:$0xff]  ;;  %s2834_s22 = sld [smem:[#allocation39_spill]] (!%p1830_p8) }
  0x53   : > { %1902 = vmatpush3.msra.mxu1 %v889_v10  ;;  %1890 = vmatprep.subr.mxu0 %v2224_v4  ;;  %v1818_v17 = vld [vmem:[%s2830_s1] ss:$0 sm:$0xff]  ;;  %s2835_s23 = sld [smem:[#allocation40_spill]] (!%p1830_p8) }
  0x54   : > { %1904 = vmatmul.mubr.msk.f32.vlgmr.msra.gmra.mxu1 %vm810_vm2, %v2475_v0  ;;  %1891 = vmatpush3.msra.mxu0 %v799_v11  ;;  %v1156_v46 = vld [vmem:[#allocation2] sm:$0xff] }
  0x55   : > { %1892 = vmatprep.mubr.msk.f32.mxu0 %vm2225_vm1, %v2224_v4  ;;  %1917 = vmatprep.subr.mxu1 %v2224_v4 }
  0x56   : > { %1893 = vmatmul.mubr.msk.f32.vlgmr.msra.gmra.mxu0 %vm810_vm2, %v2475_v0  ;;  %1919 = vmatprep.mubr.msk.f32.mxu1 %vm2225_vm1, %v2224_v4 }
  0x57   : > { %1906 = vmatprep.subr.mxu0 %v2224_v4  ;;  %1914 = vmatprep.mubr.msk.f32.mxu0 %vm2225_vm1, %v2224_v4 }
  0x58   : > { %1907 = vmatpush3.msra.mxu0 %v980_v22 }
  0x59   : > { %1908 = vmatprep.subr.mxu0 %v2224_v4 }
  0x5a   : > { %1909 = vmatpush3.msra.mxu0 %v979_v23 }
  0x5b   : > { %1910 = vmatprep.subr.mxu0 %v2224_v4 }
  0x5c   : > { %1911 = vmatpush3.msra.mxu0 %v978_v24 }
  0x5d   : > { %1912 = vmatprep.subr.mxu0 %v2224_v4 }
  0x5e   : > { %1913 = vmatpush3.msra.mxu0 %v977_v25 }
  0x5f   : > { %1915 = vmatmul.mubr.msk.f32.vlgmr.msra.gmra.mxu0 %vm810_vm2, %v2475_v0  ;;  %1927 = vmatprep.subr.mxu0 %v2224_v4 }
  0x60   : > { %1929 = vmatprep.mubr.msk.f32.mxu0 %vm2225_vm1, %v2224_v4  ;;  %1928 = vmatpush3.msra.mxu0 %v1230_v40 }
 0x114   : > { %v969_v13 = vpop.f32.mrf.mxu1 }
 0x115   : > { %v970_v14 = vadd.f32 %v1820_v12, %v969_v13 }
 0x116   : > { %v1905_v15 = vpop.f32.mrf.mxu1  ;;  %v880_v16 = vpop.f32.mrf.mxu0 }
 0x117   : > { %976 = vst.msk [vmem:[%s974_s13] sm:$0xff] %vm975_vm3, %v970_v14  ;;  %v881_v19 = vadd.f32 %v1818_v17, %v880_v16 }
 0x118   : > { %v1894_v18 = vpop.f32.mrf.mxu0 }
 0x119   : > { %v884_v20 = vmul.f32 0.35355338, %v881_v19 }
 0x11e   : > { %v1062_v21 = vld [vmem:[%s974_s13] sm:$0xff] }
 0x11f   : > { %1918 = vmatpush3.xpose.msk.msra.mxu1 %vm975_vm3, %v1062_v21  ;;  %v1054_v36 = vpop.f32.mrf.mxu0 }
 0x120   : > { %1922 = vmatprep.subr.mxu1 %v2224_v4  ;;  %v1055_v37 = vadd.f32 %v1823_v35, %v1054_v36 }
 0x121   : > { %v1916_v38 = vpop.f32.mrf.mxu0 }
 0x122   : > { %1920 = vmatmul.mubr.msk.f32.vlgmr.msra.gmra.mxu1 %vm975_vm3, %v884_v20  ;;  %1059 = vst.msk [vmem:[%s1058_s27] sm:$0xff] %vm975_vm3, %v1055_v37 }
 0x123   : > { %1924 = vmatprep.mubr.msk.f32.mxu1 %vm2225_vm1, %v2224_v4 }
 0x129   : > { %v1064_v39 = vld [vmem:[%s1058_s27] sm:$0xff] }
 0x12a   : > { %1923 = vmatpush3.msra.mxu1 %v1064_v39 }
 0x1e2   : > { %v1138_v26 = vpop.f32.mrf.mxu1 }
 0x1e3   : > { %v1143_v27 = vsel %vm1142_vm4, -1e+09, %v1138_v26 }
 0x1e4   : > { %v1921_v28 = vpop.f32.mrf.mxu1  ;;  %v1144_v29 = vsel %vm975_vm3, %v1143_v27, -inf }
 0x1e5   : > { %1145 = vmax.xlane.f32.xlu0 %v1144_v29 }
 0x26e   : > { %v1146_v30 = vpop.xlane.xlu0 %1145 }
 0x26f   : > { %v1147_v31 = vsub.f32 %v1143_v27, %v1146_v30 }
 0x271   : > { %v1148_v32 = vmul.f32 1.442695, %v1147_v31 }
 0x273   : > { %2066 = vpow2.f32 %v1148_v32 }
 0x280   : > { %v2067_v33 = vpop.eup %2066 }
 0x281   : > { %v1150_v34 = vsel %vm975_vm3, %v2067_v33, 0.0 }
 0x282   : > { %1151 = vadd.xlane.f32.xlu0 %v1150_v34 }
 0x30b   : > { %v1152_v41 = vpop.xlane.xlu0 %1151 }
 0x30c   : > { %2068 = vrcp.f32 %v1152_v41 }
 0x319   : > { %v2069_v42 = vpop.eup %2068 }
 0x31a   : > { %v1154_v43 = vmul.f32 %v2069_v42, %v2067_v33 }
 0x31c   : > { %1155 = vst.msk [vmem:[%s741_s17] sm:$0xff] %vm975_vm3, %v1154_v43  ;;  %1925 = vmatmul.mubr.msk.f32.vlgmr.msra.gmra.mxu1 %vm975_vm3, %v1154_v43 }
 0x3dc   : > { %v1226_v44 = vpop.f32.mrf.mxu1 }
 0x3dd   : > { %1930 = vmatmul.mubr.msk.f32.vlgmr.msra.gmra.mxu0 %vm975_vm3, %v1226_v44 }
 0x3de   : > { %v1926_v45 = vpop.f32.mrf.mxu1 }
 0x49c   : > { %1309 = sbr.rel (%p1830_p8) target bundleno = 2231 (0x8b7), region = 104 }
 0x49d   : > { %v1300_v47 = vpop.f32.mrf.mxu0 }
 0x49e   : > { %v1304_v48 = vadd.f32 %v1300_v47, %v1156_v46 }
 0x49f   : > { %v1931_v49 = vpop.f32.mrf.mxu0 }
 0x4a0   : > { %1305 = vst.msk [vmem:[#allocation2] sm:$0xff] %vm810_vm2, %v1304_v48 }
 0x4a1   : > { %v1345_v58 = vld [vmem:[%s2750_s12 + $0x18] sm:$0xff]  ;;  %v2226_v59 = vmov 0.0   ;;  %v1344_v60 = vld [vmem:[%s2750_s12 + $0x10] sm:$0xff]  ;;  %vm2227_vm5 = vmmov 0   ;;  %v1343_v61 = vld [vmem:[%s2750_s12 + $0x8] sm:$0xff]  ;;  %vm1450_vm6 = vcmask 523264  }
 0x4a2   : > { %1932 = vmatprep.subr.mxu0 %v2226_v59  ;;  %1940 = vmatprep.mubr.msk.f32.mxu0 %vm2227_vm5, %v2226_v59  ;;  %v1342_v62 = vld [vmem:[%s2750_s12] sm:$0xff]  ;;  %v1442_v8 = vld [vmem:[%s2831_s15 + $0x38] sm:$0xff]  ;;  %v1441_v9 = vld [vmem:[%s2831_s15 + $0x30] sm:$0xff] }
 0x4a3   : > { %1933 = vmatpush3.msra.mxu0 %v1345_v58  ;;  %1943 = vmatprep.subr.mxu1 %v2226_v59  ;;  %v1831_v3 = vld [vmem:[%s2748_s10] ss:$0 sm:$0xff]  ;;  %v1440_v10 = vld [vmem:[%s2831_s15 + $0x28] sm:$0xff]  ;;  %v1438_v12 = vld [vmem:[%s2831_s15 + $0x18] sm:$0xff] }
 0x4a4   : > { %1934 = vmatprep.subr.mxu0 %v2226_v59  ;;  %1959 = vmatprep.mubr.msk.f32.mxu1 %vm2227_vm5, %v2226_v59  ;;  %v1832_v5 = vld [vmem:[%s2749_s11] ss:$0 sm:$0xff]  ;;  %v1437_v13 = vld [vmem:[%s2831_s15 + $0x10] sm:$0xff]  ;;  %v1436_v14 = vld [vmem:[%s2831_s15 + $0x8] sm:$0xff] }
 0x4a5   : > { %1935 = vmatpush3.msra.mxu0 %v1344_v60  ;;  %1944 = vmatpush3.msra.mxu1 %v1442_v8  ;;  %v1439_v11 = vld [vmem:[%s2831_s15 + $0x20] sm:$0xff] }
 0x4a6   : > { %1936 = vmatprep.subr.mxu0 %v2226_v59  ;;  %1945 = vmatprep.subr.mxu1 %v2226_v59  ;;  %v1435_v15 = vld [vmem:[%s2831_s15] sm:$0xff] }
 0x4a7   : > { %v1310_v50 = vld [vmem:[#allocation2] sm:$0xff]  ;;  %1937 = vmatpush3.msra.mxu0 %v1343_v61  ;;  %1946 = vmatpush3.msra.mxu1 %v1441_v9 }
 0x4a8   : > { %v1311_v51 = vadd.f32 %v1310_v50, %v2475_v0  ;;  %1938 = vmatprep.subr.mxu0 %v2226_v59  ;;  %1947 = vmatprep.subr.mxu1 %v2226_v59  ;;  %v1833_v16 = vld [vmem:[%s2832_s3] ss:$0 sm:$0xff] }
 0x4a9   : > { %1939 = vmatpush3.msra.mxu0 %v1342_v62  ;;  %1948 = vmatpush3.msra.mxu1 %v1440_v10  ;;  %v1835_v29 = vld [vmem:[%s2833_s30] ss:$0 sm:$0xff] }
 0x4aa   : > { %v1314_v52 = vsel %vm810_vm2, %v1311_v51, 0.0  ;;  %1949 = vmatprep.subr.mxu1 %v2226_v59  ;;  %v1837_v44 = vld [vmem:[%s2834_s22] ss:$0 sm:$0xff] }
 0x4ab   : > { %1315 = vadd.xlane.f32.xlu0 %v1314_v52  ;;  %1950 = vmatpush3.msra.mxu1 %v1439_v11  ;;  %v1838_v46 = vld [vmem:[%s2835_s23] ss:$0 sm:$0xff] }
 0x4ac   : > { %1951 = vmatprep.subr.mxu1 %v2226_v59 }
 0x4ad   : > { %1952 = vmatpush3.msra.mxu1 %v1438_v12 }
 0x4ae   : > { %1953 = vmatprep.subr.mxu1 %v2226_v59 }
 0x4af   : > { %1954 = vmatpush3.msra.mxu1 %v1437_v13 }
 0x4b0   : > { %1955 = vmatprep.subr.mxu1 %v2226_v59 }
 0x4b1   : > { %1956 = vmatpush3.msra.mxu1 %v1436_v14 }
 0x4b2   : > { %1957 = vmatprep.subr.mxu1 %v2226_v59 }
 0x4b3   : > { %1958 = vmatpush3.msra.mxu1 %v1435_v15 }
 0x534   : > { %v1316_v53 = vpop.xlane.xlu0 %1315 }
 0x535   : > { %v1318_v54 = vmul.f32 0.03125, %v1316_v53 }
 0x537   : > { %v1319_v55 = vsub.f32 %v1311_v51, %v1318_v54 }
 0x539   : > { %v1320_v56 = vmul.f32 %v1319_v55, %v1319_v55 }
 0x53b   : > { %v1321_v57 = vsel %vm810_vm2, %v1320_v56, 0.0 }
 0x53c   : > { %1322 = vadd.xlane.f32.xlu0 %v1321_v57 }
 0x5c5   : > { %v1323_v63 = vpop.xlane.xlu0 %1322 }
 0x5c6   : > { %v1324_v0 = vmul.f32 0.03125, %v1323_v63 }
 0x5c8   : > { %v1325_v1 = vadd.f32 1e-05, %v1324_v0 }
 0x5ca   : > { %2070 = vrsqrt.f32 %v1325_v1 }
 0x5d7   : > { %v2071_v2 = vpop.eup %2070 }
 0x5d8   : > { %v1327_v4 = vmul.f32 %v2071_v2, %v1319_v55 }
 0x5da   : > { %v1334_v6 = vmul.f32 %v1831_v3, %v1327_v4 }
 0x5dc   : > { %v1341_v7 = vadd.f32 %v1832_v5, %v1334_v6 }
 0x5de   : > { %1941 = vmatmul.mubr.msk.f32.vlgmr.msra.gmra.mxu0 %vm810_vm2, %v1341_v7 }
 0x69e   : > { %v1422_v17 = vpop.f32.mrf.mxu0 }
 0x69f   : > { %v1423_v18 = vadd.f32 %v1833_v16, %v1422_v17 }
 0x6a0   : > { %v1942_v19 = vpop.f32.mrf.mxu0 }
 0x6a1   : > { %v1427_v20 = vmul.f32 0.044715, %v1423_v18  ;;  %v1426_v26 = vmul.f32 0.5, %v1423_v18 }
 0x6a3   : > { %v1428_v21 = vmul.f32 %v1427_v20, %v1423_v18 }
 0x6a5   : > { %v1429_v22 = vmul.f32 %v1428_v21, %v1423_v18 }
 0x6a7   : > { %v1430_v23 = vadd.f32 %v1429_v22, %v1423_v18 }
 0x6a9   : > { %v1431_v24 = vmul.f32 0.7978846, %v1430_v23 }
 0x6ab   : > { %2072 = vtanh.f32 %v1431_v24 }
 0x6b8   : > { %v2073_v25 = vpop.eup %2072 }
 0x6b9   : > { %v1433_v27 = vadd.f32 1.0, %v2073_v25 }
 0x6bb   : > { %v1434_v28 = vmul.f32 %v1433_v27, %v1426_v26 }
 0x6bd   : > { %1960 = vmatmul.mubr.msk.f32.vlgmr.msra.gmra.mxu1 %vm1450_vm6, %v1434_v28 }
 0x77d   : > { %v1520_v30 = vpop.f32.mrf.mxu1 }
 0x77e   : > { %v1521_v31 = vadd.f32 %v1835_v29, %v1520_v30 }
 0x77f   : > { %v1961_v32 = vpop.f32.mrf.mxu1 }
 0x780   : > { %v1524_v33 = vadd.f32 %v1521_v31, %v1341_v7 }
 0x782   : > { %v1527_v34 = vsel %vm810_vm2, %v1524_v33, 0.0 }
 0x783   : > { %1528 = vadd.xlane.f32.xlu1 %v1527_v34 }
 0x80c   : > { %v1529_v35 = vpop.xlane.xlu1 %1528 }
 0x80d   : > { %v1530_v36 = vmul.f32 0.03125, %v1529_v35 }
 0x80f   : > { %v1531_v37 = vsub.f32 %v1524_v33, %v1530_v36 }
 0x811   : > { %v1532_v38 = vmul.f32 %v1531_v37, %v1531_v37 }
 0x813   : > { %v1533_v39 = vsel %vm810_vm2, %v1532_v38, 0.0 }
 0x814   : > { %1534 = vadd.xlane.f32.xlu1 %v1533_v39 }
 0x89d   : > { %v1535_v40 = vpop.xlane.xlu1 %1534 }
 0x89e   : > { %v1536_v41 = vmul.f32 0.03125, %v1535_v40 }
 0x8a0   : > { %v1537_v42 = vadd.f32 1e-05, %v1536_v41 }
 0x8a2   : > { %2074 = vrsqrt.f32 %v1537_v42 }
 0x8af   : > { %v2075_v43 = vpop.eup %2074 }
 0x8b0   : > { %v1539_v45 = vmul.f32 %v2075_v43, %v1531_v37 }
 0x8b2   : > { %v1546_v47 = vmul.f32 %v1837_v44, %v1539_v45 }
 0x8b4   : > { %v1553_v48 = vadd.f32 %v1838_v46, %v1546_v47 }
 0x8b6   : > { %1554 = vst.msk [vmem:[%s734_s29] sm:$0xff] %vm810_vm2, %v1553_v48 }
 0x8b7 PF: > { %s2836_s16 = sld [smem:[#allocation17_spill]]  ;;  %s1575_s30 = sshll.u32 %s734_s29, 4  ;;  %s1576_s30 = int_to_ptr.vmem [resolvable:$true] %s1575_s30 }
 0x8b8   : > { %s2837_s13 = sld [smem:[#allocation15_spill]]  ;;  %s2076_s22 = scalar_lea.vmem %s1576_s30, 128 }
 0x8b9   : > { %s2839_s3 = sld [smem:[#allocation41_spill]]  ;;  %p2077_p9 = scmp.ne.s32.totalorder %s1576_s30, %s2076_s22 }
 0x8ba   : > { %s2228_s24 = smov [#allocation5]  }
 0x8bb   : > { %p2078_p10 = pnand %p2077_p9, %p2401_p3  ;;  %s2080_s14 = sshll.u32 %s2228_s24, 4  ;;  %s2081_s14 = int_to_ptr.vmem [resolvable:$false] %s2080_s14 }
 0x8bc   : > { %s2082_s23 = scalar_lea.vmem %s2081_s14, 256  ;;  %p2083_p0 = scmp.lt.s32.totalorder %s1576_s30, %s2081_s14 }
 0x8bd   : > { %s1841_s20 = sshll.u32 %s2836_s16, 7  ;;  %p2079_p11 = pneg %p2078_p10 }
 0x8be   : > { %s2841_s21 = sand.u32 1, %s2837_s13   ;;  %p2084_p1 = scmp.lt.s32.totalorder %s2082_s23, %s2076_s22 }
 0x8bf   : > { %s2840_s27 = smov %s2839_s3  ;;  %s1573_s26 = scalar_lea.hbm %s2839_s3, %s1841_s20 }
 0x8c0   : > { %s1556_s25 = scalar_lea.sflag [#allocation6], %s2841_s21  ;;  %p2085_p4 = por %p2084_p1, %p2083_p0 }
 0x8c2   : > { %p2086_p2 = pnand %p2085_p4, %p2079_p11 }
 0x8c4   : > { %2089 = shalt.err (!%p2086_p2)
}
 0x8c5   : > { %s2090_s20 = scalar_lea.hbm %s1573_s26, 128  ;;  %s2094_s13 = scalar_lea.hbm %s2840_s27, 256 }
 0x8c6   : > { %p2091_p5 = scmp.ne.s32.totalorder %s1573_s26, %s2090_s20  ;;  %p2095_p9 = scmp.lt.s32.totalorder %s1573_s26, %s2840_s27 }
 0x8c7   : > { %p2096_p10 = scmp.lt.s32.totalorder %s2094_s13, %s2090_s20 }
 0x8c8   : > { %p2092_p6 = pnand %p2091_p5, %p2401_p3 }
 0x8c9   : > { %p2097_p13 = por %p2096_p10, %p2095_p9 }
 0x8ca   : > { %p2093_p8 = pneg %p2092_p6 }
 0x8cc   : > { %p2098_p7 = pnand %p2097_p13, %p2093_p8 }
 0x8ce   : > { %2101 = shalt.err (!%p2098_p7)
}
 0x8cf   : > { %s2842_s3 = sld [smem:[#allocation12_spill]]  ;;  %s1842_s22 = sshll.u32 %s2836_s16, 2 }
 0x8d0   : > { %1962 = dma.vmem_to_hbm [thread:$0]  (%p2401_p3), %s1576_s30, 128, %s1573_s26, %s1556_s25  }
 0x8d1   : > { %s1591_s24 = sshll.u32 %s741_s17, 4  ;;  %s1587_s14 = sadd.s32 %s2206_s2, %s1842_s22  ;;  %s1592_s24 = int_to_ptr.vmem [resolvable:$true] %s1591_s24 }
 0x8d2   : > { %s1843_s23 = sshll.u32 %s1587_s14, 7  ;;  %s2844_s20 = sld [smem:[#allocation42_spill]] }
 0x8d3   : > { %s2102_s5 = scalar_lea.vmem %s1592_s24, 128  ;;  %s2229_s0 = smov [#allocation7]  }
 0x8d4   : > { %p2103_p7 = scmp.ne.s32.totalorder %s1592_s24, %s2102_s5  ;;  %s2106_s6 = sshll.u32 %s2229_s0, 4  ;;  %s2107_s6 = int_to_ptr.vmem [resolvable:$false] %s2106_s6 }
 0x8d5   : > { %s2846_s1 = sand.u32 1, %s2842_s3   ;;  %s2108_s16 = scalar_lea.vmem %s2107_s6, 256 }
 0x8d6   : > { %s1561_s4 = scalar_lea.sflag [#allocation8], %s2846_s1  ;;  %p2104_p13 = pnand %p2103_p7, %p2430_p12 }
 0x8d7   : > { %p2109_p3 = scmp.lt.s32.totalorder %s1592_s24, %s2107_s6  ;;  %p2110_p0 = scmp.lt.s32.totalorder %s2108_s16, %s2102_s5 }
 0x8d8   : > { %s2845_s13 = smov %s2844_s20  ;;  %s1589_s28 = scalar_lea.hbm %s2844_s20, %s1843_s23 }
 0x8d9   : > { %p2105_p11 = pneg %p2104_p13  ;;  %p2111_p1 = por %p2110_p0, %p2109_p3 }
 0x8db   : > { %p2112_p4 = pnand %p2111_p1, %p2105_p11 }
 0x8dd   : > { %2115 = shalt.err (!%p2112_p4)
}
 0x8de   : > { %s2116_s17 = scalar_lea.hbm %s1589_s28, 128  ;;  %s2120_s26 = scalar_lea.hbm %s2845_s13, 1024 }
 0x8df   : > { %p2117_p2 = scmp.ne.s32.totalorder %s1589_s28, %s2116_s17  ;;  %p2121_p8 = scmp.lt.s32.totalorder %s1589_s28, %s2845_s13 }
 0x8e0   : > { %p2122_p9 = scmp.lt.s32.totalorder %s2120_s26, %s2116_s17 }
 0x8e1   : > { %p2118_p5 = pnand %p2117_p2, %p2430_p12 }
 0x8e2   : > { %p2123_p10 = por %p2122_p9, %p2121_p8 }
 0x8e3   : > { %p2119_p6 = pneg %p2118_p5 }
 0x8e5   : > { %p2124_p7 = pnand %p2123_p10, %p2119_p6 }
 0x8e7   : > { %2127 = shalt.err (!%p2124_p7)
}
 0x8e8   : > { %1963 = dma.vmem_to_hbm [thread:$0]  (%p2430_p12), %s1592_s24, 128, %s1589_s28, %s1561_s4  }
 0x8e9 PF: > { %s2847_s5 = sld [smem:[#allocation20_spill]] }
 0x8ea   : > { %s2848_s6 = sld [smem:[#allocation14_spill]] }
 0x8eb   : > { %s2849_s3 = sld [smem:[#allocation24_spill]] }
 0x8ef   : > { %p1973_p13 = scmp.ge.s32.totalorder %s2847_s5, 2 }
 0x8f0   : > { %s1603_s22 = sand.u32 1, %s2848_s6  }
 0x8f1   : > { %p2850_p11 = scmp.ne.s32.totalorder %s2849_s3, 0  ;;  %s1604_s14 = scalar_lea.sflag [#allocation6], %s1603_s22 }
 0x8f3   : > { %p1967_p3 = pnand %p1973_p13, %p2850_p11 }
 0x8f5   : > { %p1968_p0 = pneg %p1967_p3 }
 0x8f7   : > { %2173 = dma.done.wait (%p1968_p0), %s1604_s14, 128  }
 0x8f8   : > { %2175 = vsyncadd (%p1968_p0), %s1604_s14, 4294967168  ;;  %s2851_s23 = sld [smem:[#allocation11_spill]] }
 0x8f9   : > { %s2852_s18 = sld [smem:[#allocation28_spill]] }
 0x8fe   : > { %s1612_s29 = sand.u32 1, %s2851_s23  }
 0x8ff   : > { %p2853_p1 = scmp.ne.s32.totalorder %s2852_s18, 0  ;;  %s1613_s21 = scalar_lea.sflag [#allocation8], %s1612_s29 }
 0x901   : > { %p1970_p4 = pnand %p1973_p13, %p2853_p1 }
 0x903   : > { %p1971_p2 = pneg %p1970_p4 }
 0x905   : > { %2177 = dma.done.wait (%p1971_p2), %s1613_s21, 128  }
 0x906   : > { %2179 = vsyncadd (%p1971_p2), %s1613_s21, 4294967168  ;;  %s36_s3 = sadd.s32 1, %s2847_s5   ;;  %s2854_s0 = sld [smem:[#allocation12_spill]] }
 0x907   : > { %p33_p12 = scmp.ge.s32.totalorder %s36_s3, 10   ;;  %s2855_s30 = sld [smem:[#allocation13_spill]] }
 0x908   : > { %s2856_s20 = sld [smem:[#allocation27_spill]] }
 0x909   : > { %s2857_s21 = sld [smem:[#allocation15_spill]] }
 0x90a   : > { %s2858_s1 = sld [smem:[#allocation16_spill]] }
 0x90b   : > { %s2859_s22 = sld [smem:[#allocation26_spill]]  ;;  %35 = sbr.rel (!%p33_p12) target bundleno = 24 (0x18), region = 185 }
 0x90c   : > { %s2860_s2 = sld [smem:[#allocation18_spill]] }
 0x90d   : > { %s2861_s23 = sld [smem:[#allocation19_spill]] }
 0x90e   : > { %s2862_s24 = sld [smem:[#allocation21_spill]] }
 0x90f   : > { %s2863_s25 = sld [smem:[#allocation23_spill]] }
 0x910   :  { %1618 = vsyncpa [#allocation6], 1 }
 0x911   :  { %1620 = vsyncpa [#allocation6 + $0x1], 1 }
 0x912   :  { %1621 = vsyncpa [#allocation8], 1 }
 0x913   :  { %1623 = vsyncpa [#allocation8 + $0x1], 1 }

</bundles_post_ra>
